<compile_context>
chip_gen: v7x
topology: tpu7x:2x2x1
jax: 0.10.0
libtpu: 0.0.40
codegen_flags: <defaults>
</compile_context>

<pallas_src>
import jax
import jax.numpy as jnp
from jax.experimental import pallas as pl
from jax.experimental.pallas import tpu as pltpu


_LANE = 128  # TPU lane width; output slab width and batch-tile granularity.


def _round_up(x, m):
    return (x + m - 1) // m * m


def _qnet_kernel(obs_ref, act_ref, w1o_ref, w1a_ref, b1_ref,
                 w2_ref, b2_ref, w3_ref, b3_ref, o_ref):
    """Fused (Linear -> ReLU) x 2 -> Linear(out=1) over one batch tile."""
    # Layer 1: split matmul replaces the host-side concat([obs, act], -1).
    h = (jnp.dot(obs_ref[...], w1o_ref[...], preferred_element_type=jnp.float32)
         + jnp.dot(act_ref[...], w1a_ref[...], preferred_element_type=jnp.float32)
         + b1_ref[...])
    h = jnp.maximum(h, 0.0)

    # Layer 2 (bf16 operands when compute_dtype=bf16, f32 accumulation).
    h = jnp.dot(h.astype(w2_ref.dtype), w2_ref[...],
                preferred_element_type=jnp.float32) + b2_ref[...]
    h = jnp.maximum(h, 0.0)

    # Layer 3: out_features == 1 -> VPU reduction instead of an N=1 MXU matmul.
    q = jnp.sum(h * w3_ref[...], axis=-1, keepdims=True) + b3_ref[0]   # [TB, 1]

    # Lane-dense store: broadcast across the 128 lanes (unmasked vst); the
    # wrapper keeps column 0.
    o_ref[...] = jnp.broadcast_to(q, o_ref.shape).astype(o_ref.dtype)


def prepare_params(torch_params, obs_dim, compute_dtype=jnp.bfloat16):
    """One-time reshaping of PyTorch-shaped params (W [out,in], b [out]).

    Done once at init time so the per-call path has no transposes/splits.
    """
    w1 = torch_params["w1"]                                   # [h1, obs+act]
    return {
        "w1o": jnp.asarray(w1[:, :obs_dim].T, compute_dtype),  # [obs_dim, h1]
        "w1a": jnp.asarray(w1[:, obs_dim:].T, compute_dtype),  # [act_dim, h1]
        "b1": jnp.asarray(torch_params["b1"][None, :], jnp.float32),   # [1, h1]
        "w2": jnp.asarray(torch_params["w2"].T, compute_dtype),        # [h1, h2]
        "b2": jnp.asarray(torch_params["b2"][None, :], jnp.float32),   # [1, h2]
        "w3": jnp.asarray(torch_params["w3"], jnp.float32),            # [1, h2] row
        "b3": jnp.asarray(torch_params["b3"], jnp.float32),            # [1] scalar
    }


def mlp_q_network_forward(obs, act, kparams, *, batch_tile=512):
    """Q-network forward.  obs: [B, obs_dim], act: [B, act_dim] -> q: [B]."""
    B, obs_dim = obs.shape
    act_dim = act.shape[1]
    cdt = kparams["w1o"].dtype

    # Batch tiling: one lane-aligned tile for small batches; fixed tile
    # (multiple of 128) with a pipelined, core-parallel grid for large batches.
    if B <= 2 * batch_tile:
        tb = _round_up(max(B, 1), _LANE)
    else:
        tb = batch_tile
    b_pad = _round_up(B, tb)
    grid = b_pad // tb

    obs_p = obs.astype(cdt)
    act_p = act.astype(cdt)
    if b_pad != B:
        pad = ((0, b_pad - B), (0, 0))
        obs_p = jnp.pad(obs_p, pad)
        act_p = jnp.pad(act_p, pad)

    def batch_spec(feat):
        return pl.BlockSpec((tb, feat), lambda i: (i, 0))

    def resident(shape):
        # Full-array block; constant index_map -> loaded once, stays in VMEM.
        return pl.BlockSpec(shape, lambda i: (0,) * len(shape))

    out = pl.pallas_call(
        _qnet_kernel,
        out_shape=jax.ShapeDtypeStruct((b_pad, _LANE), jnp.float32),
        grid_spec=pltpu.PrefetchScalarGridSpec(
            num_scalar_prefetch=0,
            grid=(grid,),
            in_specs=[
                batch_spec(obs_dim),
                batch_spec(act_dim),
                resident(kparams["w1o"].shape),
                resident(kparams["w1a"].shape),
                resident(kparams["b1"].shape),
                resident(kparams["w2"].shape),
                resident(kparams["b2"].shape),
                resident(kparams["w3"].shape),
                pl.BlockSpec(memory_space=pltpu.MemorySpace.SMEM),  # b3 scalar
            ],
            out_specs=pl.BlockSpec((tb, _LANE), lambda i: (i, 0)),
        ),
        compiler_params=pltpu.CompilerParams(
            dimension_semantics=("parallel",)),   # megacore sharding on v7x
    )(obs_p, act_p, kparams["w1o"], kparams["w1a"], kparams["b1"],
      kparams["w2"], kparams["b2"], kparams["w3"], kparams["b3"])

    # torch.squeeze(q, -1): keep column 0 of the lane-dense slab, drop padding.
    return out[:B, 0]


def init_params(key, obs_dim, act_dim, hidden_sizes):
    """Deterministic synthetic init (PyTorch Linear shapes: W [out, in], b [out])."""
    sizes = [obs_dim + act_dim] + list(hidden_sizes) + [1]
    params = {}
    for i in range(len(sizes) - 1):
        fan_in, fan_out = sizes[i], sizes[i + 1]
        key, kw, kb = jax.random.split(key, 3)
        bound = 1.0 / jnp.sqrt(fan_in)
        params[f"w{i+1}"] = jax.random.uniform(
            kw, (fan_out, fan_in), jnp.float32, -bound, bound)
        params[f"b{i+1}"] = jax.random.uniform(
            kb, (fan_out,), jnp.float32, -bound, bound)
    return params


def _reference_forward(obs, act, torch_params):
    """Pure-JAX f32 reference for correctness checking."""
    x = jnp.concatenate([obs, act], axis=-1)
    h = jnp.maximum(x @ torch_params["w1"].T + torch_params["b1"], 0.0)
    h = jnp.maximum(h @ torch_params["w2"].T + torch_params["b2"], 0.0)
    q = h @ torch_params["w3"].T + torch_params["b3"]
    return jnp.squeeze(q, -1)


if __name__ == "__main__":
    key = jax.random.PRNGKey(0)

    obs_dim, act_dim, hidden_sizes = 24, 8, (32, 32)
    key, k_params = jax.random.split(key)
    torch_params = init_params(k_params, obs_dim, act_dim, hidden_sizes)

    params_bf16 = prepare_params(torch_params, obs_dim, compute_dtype=jnp.bfloat16)
    params_f32 = prepare_params(torch_params, obs_dim, compute_dtype=jnp.float32)

    # --- small batch (single tile) ---
    batch = 8
    key, k_obs, k_act = jax.random.split(key, 3)
    obs = jax.random.normal(k_obs, (batch, obs_dim), jnp.float32)
    act = jax.random.normal(k_act, (batch, act_dim), jnp.float32)
    q_ref = _reference_forward(obs, act, torch_params)

    q_f32 = jax.block_until_ready(mlp_q_network_forward(obs, act, params_f32))
    assert q_f32.shape == (batch,), q_f32.shape
    assert jnp.allclose(q_f32, q_ref, atol=1e-2, rtol=1e-2), (q_f32, q_ref)

    q_bf16 = jax.block_until_ready(mlp_q_network_forward(obs, act, params_bf16))
    assert q_bf16.shape == (batch,), q_bf16.shape
    assert jnp.allclose(q_bf16, q_ref, atol=5e-2, rtol=5e-2), (q_bf16, q_ref)

    # --- larger, non-tile-multiple batch: exercises padding + pipelined
    #     multi-step ("parallel") grid (2000 -> 2048 rows, 4 tiles of 512) ---
    big = 2000
    key, k_obs2, k_act2 = jax.random.split(key, 3)
    obs2 = jax.random.normal(k_obs2, (big, obs_dim), jnp.float32)
    act2 = jax.random.normal(k_act2, (big, act_dim), jnp.float32)
    q2 = jax.block_until_ready(mlp_q_network_forward(obs2, act2, params_f32))
    q2_ref = _reference_forward(obs2, act2, torch_params)
    assert q2.shape == (big,), q2.shape
    assert jnp.allclose(q2, q2_ref, atol=1e-2, rtol=1e-2)

    print("KERNEL_OK")
</pallas_src>

<mosaic_0001>
module attributes {stable_mosaic.version = 11 : i64} {
  func.func @_qnet_kernel(%arg0: i32, %arg1: memref<128x24xf32, #tpu.memory_space<vmem>>, %arg2: memref<128x8xf32, #tpu.memory_space<vmem>>, %arg3: memref<24x32xf32, #tpu.memory_space<vmem>>, %arg4: memref<8x32xf32, #tpu.memory_space<vmem>>, %arg5: memref<1x32xf32, #tpu.memory_space<vmem>>, %arg6: memref<32x32xf32, #tpu.memory_space<vmem>>, %arg7: memref<1x32xf32, #tpu.memory_space<vmem>>, %arg8: memref<1x32xf32, #tpu.memory_space<vmem>>, %arg9: memref<1xf32, #tpu.memory_space<smem>>, %arg10: memref<128x128xf32, #tpu.memory_space<vmem>>) attributes {dimension_semantics = [#tpu.dimension_semantics<parallel>], iteration_bounds = array<i64: 1>, scalar_prefetch = 0 : i64, scratch_operands = 0 : i64, tpu.core_type = #tpu.core_type<tc>, window_params = [{transform_indices = @transform_0, window_bounds = array<i64: 128, 24>}, {transform_indices = @transform_1, window_bounds = array<i64: 128, 8>}, {pipeline_mode = #tpu.pipeline_mode<synchronous>, transform_indices = @transform_2, window_bounds = array<i64: 24, 32>}, {pipeline_mode = #tpu.pipeline_mode<synchronous>, transform_indices = @transform_3, window_bounds = array<i64: 8, 32>}, {pipeline_mode = #tpu.pipeline_mode<synchronous>, transform_indices = @transform_4, window_bounds = array<i64: 1, 32>}, {pipeline_mode = #tpu.pipeline_mode<synchronous>, transform_indices = @transform_5, window_bounds = array<i64: 32, 32>}, {pipeline_mode = #tpu.pipeline_mode<synchronous>, transform_indices = @transform_6, window_bounds = array<i64: 1, 32>}, {pipeline_mode = #tpu.pipeline_mode<synchronous>, transform_indices = @transform_7, window_bounds = array<i64: 1, 32>}, {transform_indices = @transform_8, window_bounds = array<i64: 1>}, {transform_indices = @transform_9, window_bounds = array<i64: 128, 128>}]} {
    %c0 = arith.constant 0 : index
    %c0_0 = arith.constant 0 : index
    %0 = vector.load %arg1[%c0, %c0_0] : memref<128x24xf32, #tpu.memory_space<vmem>>, vector<128x24xf32>
    %c0_1 = arith.constant 0 : index
    %c0_2 = arith.constant 0 : index
    %1 = vector.load %arg3[%c0_1, %c0_2] : memref<24x32xf32, #tpu.memory_space<vmem>>, vector<24x32xf32>
    %cst = arith.constant dense<0.000000e+00> : vector<128x32xf32>
    %2 = tpu.matmul %0, %1, %cst {dimension_numbers = #tpu.dot_dimension_numbers<[1], [0], [0], [1], [0, 0, 1, 1], [], []>} : vector<128x24xf32>, vector<24x32xf32>, vector<128x32xf32> -> vector<128x32xf32>
    %c0_3 = arith.constant 0 : index
    %c0_4 = arith.constant 0 : index
    %3 = vector.load %arg2[%c0_3, %c0_4] : memref<128x8xf32, #tpu.memory_space<vmem>>, vector<128x8xf32>
    %c0_5 = arith.constant 0 : index
    %c0_6 = arith.constant 0 : index
    %4 = vector.load %arg4[%c0_5, %c0_6] : memref<8x32xf32, #tpu.memory_space<vmem>>, vector<8x32xf32>
    %cst_7 = arith.constant dense<0.000000e+00> : vector<128x32xf32>
    %5 = tpu.matmul %3, %4, %cst_7 {dimension_numbers = #tpu.dot_dimension_numbers<[1], [0], [0], [1], [0, 0, 1, 1], [], []>} : vector<128x8xf32>, vector<8x32xf32>, vector<128x32xf32> -> vector<128x32xf32>
    %6 = arith.addf %2, %5 : vector<128x32xf32>
    %c0_8 = arith.constant 0 : index
    %c0_9 = arith.constant 0 : index
    %7 = vector.load %arg5[%c0_8, %c0_9] : memref<1x32xf32, #tpu.memory_space<vmem>>, vector<1x32xf32>
    %8 = vector.broadcast %7 : vector<1x32xf32> to vector<128x32xf32>
    %9 = arith.addf %6, %8 : vector<128x32xf32>
    %cst_10 = arith.constant 0.000000e+00 : f32
    %10 = vector.broadcast %cst_10 : f32 to vector<128x32xf32>
    %11 = arith.maximumf %9, %10 : vector<128x32xf32>
    %c0_11 = arith.constant 0 : index
    %c0_12 = arith.constant 0 : index
    %12 = vector.load %arg6[%c0_11, %c0_12] : memref<32x32xf32, #tpu.memory_space<vmem>>, vector<32x32xf32>
    %cst_13 = arith.constant dense<0.000000e+00> : vector<128x32xf32>
    %13 = tpu.matmul %11, %12, %cst_13 {dimension_numbers = #tpu.dot_dimension_numbers<[1], [0], [0], [1], [0, 0, 1, 1], [], []>} : vector<128x32xf32>, vector<32x32xf32>, vector<128x32xf32> -> vector<128x32xf32>
    %c0_14 = arith.constant 0 : index
    %c0_15 = arith.constant 0 : index
    %14 = vector.load %arg7[%c0_14, %c0_15] : memref<1x32xf32, #tpu.memory_space<vmem>>, vector<1x32xf32>
    %15 = vector.broadcast %14 : vector<1x32xf32> to vector<128x32xf32>
    %16 = arith.addf %13, %15 : vector<128x32xf32>
    %cst_16 = arith.constant 0.000000e+00 : f32
    %17 = vector.broadcast %cst_16 : f32 to vector<128x32xf32>
    %18 = arith.maximumf %16, %17 : vector<128x32xf32>
    %c0_17 = arith.constant 0 : index
    %c0_18 = arith.constant 0 : index
    %19 = vector.load %arg8[%c0_17, %c0_18] : memref<1x32xf32, #tpu.memory_space<vmem>>, vector<1x32xf32>
    %20 = vector.broadcast %19 : vector<1x32xf32> to vector<128x32xf32>
    %21 = arith.mulf %18, %20 : vector<128x32xf32>
    %cst_19 = arith.constant dense<0.000000e+00> : vector<128xf32>
    %22 = vector.multi_reduction <add>, %21, %cst_19 [1] : vector<128x32xf32> to vector<128xf32>
    %23 = vector.shape_cast %22 : vector<128xf32> to vector<128x1xf32>
    %c0_20 = arith.constant 0 : index
    %24 = memref.load %arg9[%c0_20] : memref<1xf32, #tpu.memory_space<smem>>
    %25 = vector.broadcast %24 : f32 to vector<128x1xf32>
    %26 = arith.addf %23, %25 : vector<128x1xf32>
    %27 = vector.shape_cast %26 : vector<128x1xf32> to vector<128x1xf32>
    %28 = vector.broadcast %27 : vector<128x1xf32> to vector<128x128xf32>
    %c0_21 = arith.constant 0 : index
    %c0_22 = arith.constant 0 : index
    %29 = vector.load %arg10[%c0_21, %c0_22] : memref<128x128xf32, #tpu.memory_space<vmem>>, vector<128x128xf32>
    tpu.vector_store %arg10[%c0_21, %c0_22], %28 {strides = array<i32>} : memref<128x128xf32, #tpu.memory_space<vmem>>, vector<128x128xf32>,
    return
  }
  func.func @transform_0(%arg0: i32) -> (i32, i32) {
    %c0_i32 = arith.constant 0 : i32
    %c0_i32_0 = arith.constant 0 : i32
    return %arg0, %c0_i32 : i32, i32
  }
  func.func @transform_1(%arg0: i32) -> (i32, i32) {
    %c0_i32 = arith.constant 0 : i32
    %c0_i32_0 = arith.constant 0 : i32
    return %arg0, %c0_i32 : i32, i32
  }
  func.func @transform_2(%arg0: i32) -> (i32, i32) {
    %c0_i32 = arith.constant 0 : i32
    %c0_i32_0 = arith.constant 0 : i32
    %c0_i32_1 = arith.constant 0 : i32
    return %c0_i32, %c0_i32_0 : i32, i32
  }
  func.func @transform_3(%arg0: i32) -> (i32, i32) {
    %c0_i32 = arith.constant 0 : i32
    %c0_i32_0 = arith.constant 0 : i32
    %c0_i32_1 = arith.constant 0 : i32
    return %c0_i32, %c0_i32_0 : i32, i32
  }
  func.func @transform_4(%arg0: i32) -> (i32, i32) {
    %c0_i32 = arith.constant 0 : i32
    %c0_i32_0 = arith.constant 0 : i32
    %c0_i32_1 = arith.constant 0 : i32
    return %c0_i32, %c0_i32_0 : i32, i32
  }
  func.func @transform_5(%arg0: i32) -> (i32, i32) {
    %c0_i32 = arith.constant 0 : i32
    %c0_i32_0 = arith.constant 0 : i32
    %c0_i32_1 = arith.constant 0 : i32
    return %c0_i32, %c0_i32_0 : i32, i32
  }
  func.func @transform_6(%arg0: i32) -> (i32, i32) {
    %c0_i32 = arith.constant 0 : i32
    %c0_i32_0 = arith.constant 0 : i32
    %c0_i32_1 = arith.constant 0 : i32
    return %c0_i32, %c0_i32_0 : i32, i32
  }
  func.func @transform_7(%arg0: i32) -> (i32, i32) {
    %c0_i32 = arith.constant 0 : i32
    %c0_i32_0 = arith.constant 0 : i32
    %c0_i32_1 = arith.constant 0 : i32
    return %c0_i32, %c0_i32_0 : i32, i32
  }
  func.func @transform_8(%arg0: i32) -> i32 {
    %c0_i32 = arith.constant 0 : i32
    %c0_i32_0 = arith.constant 0 : i32
    return %c0_i32 : i32
  }
  func.func @transform_9(%arg0: i32) -> (i32, i32) {
    %c0_i32 = arith.constant 0 : i32
    %c0_i32_0 = arith.constant 0 : i32
    return %arg0, %c0_i32 : i32, i32
  }
}

</mosaic_0001>

<bundles_post_ra>
// kernel: tpu_custom_call.1
= control target key start
LH: loop header
LB: loop body
LE: loop exit
PB: predicated region body
PF: predicated region fallthrough
CT: control target
= control target key end

     0   :  { %vm70_vm0 = vcmask 64512   ;;  %vm264_vm1 = vcmask 195584   ;;  %s1406_s0 = inlined_call_operand.vmem [shape: f32[128,24], index: 0, kind: input, shape index: {}]   ;;  %s1407_s1 = inlined_call_operand.vmem [shape: f32[128,8], index: 1, kind: input, shape index: {}]   ;;  %s1408_s2 = inlined_call_operand.vmem [shape: f32[24,32], index: 2, kind: input, shape index: {}]   ;;  %s1409_s3 = inlined_call_operand.vmem [shape: f32[8,32], index: 3, kind: input, shape index: {}]   ;;  %s1410_s4 = inlined_call_operand.vmem [shape: f32[1,32], index: 4, kind: input, shape index: {}]   ;;  %s1411_s5 = inlined_call_operand.vmem [shape: f32[32,32], index: 5, kind: input, shape index: {}]   ;;  %s1412_s6 = inlined_call_operand.vmem [shape: f32[1,32], index: 6, kind: input, shape index: {}]   ;;  %s1413_s7 = inlined_call_operand.vmem [shape: f32[1,32], index: 7, kind: input, shape index: {}]   ;;  %s1414_s8 = inlined_call_operand.<no memory space> [shape: f32[1], index: 8, kind: input, shape index: {}]   ;;  %s1415_s9 = inlined_call_operand.hbm [shape: f32[128,128], index: 9, kind: output, shape index: {}]  }
   0x1   :  { %v69_v0 = vld [vmem:[%s1409_s3] sm:$0xff]  ;;  %v54_v2 = vld [vmem:[%s1407_s1 + $0x8] sm:$0xff]  ;;  %v55_v5 = vld [vmem:[%s1407_s1 + $0x10] sm:$0xff] }
   0x2   :  { %v53_v1 = vld [vmem:[%s1407_s1] sm:$0xff]  ;;  %946 = vmatprep.subr.mxu0 %v69_v0  ;;  %v51_v4 = vld [vmem:[%s1408_s2 + $0x8] sm:$0xff]  ;;  %1046 = vmatprep.subr.mxu1 %v69_v0  ;;  %v52_v7 = vld [vmem:[%s1408_s2 + $0x10] sm:$0xff] }
   0x3   :  { %948 = vmatprep.mubr.msk.f32.mxu0 %vm70_vm0, %v53_v1  ;;  %v50_v3 = vld [vmem:[%s1408_s2] sm:$0xff]  ;;  %947 = vmatpush3.msra.mxu0 %v69_v0  ;;  %v56_v8 = vld [vmem:[%s1407_s1 + $0x18] sm:$0xff]  ;;  %v62_v11 = vld [vmem:[%s1407_s1 + $0x48] sm:$0xff] }
   0x4   :  { %v1034_v6 = vpack.c.bf16 %v51_v4, %v50_v3  ;;  %949 = vmatmul.mubr.msk.f32.vlgmr.msra.gmra.mrb[0].mxu0 %vm70_vm0, %v54_v2  ;;  %1047 = vmatpush3.msra.mxu1 %v69_v0  ;;  %v57_v9 = vld [vmem:[%s1407_s1 + $0x20] sm:$0xff]  ;;  %v58_v12 = vld [vmem:[%s1407_s1 + $0x28] sm:$0xff]  ;;  %v63_v13 = vld [vmem:[%s1407_s1 + $0x50] sm:$0xff] }
   0x5   :  { %951 = vmatprep.mubr.msk.f32.mxu0 %vm70_vm0, %v55_v5  ;;  %v61_v10 = vld [vmem:[%s1407_s1 + $0x40] sm:$0xff]  ;;  %v59_v14 = vld [vmem:[%s1407_s1 + $0x30] sm:$0xff]  ;;  %v64_v15 = vld [vmem:[%s1407_s1 + $0x58] sm:$0xff] }
   0x6   :  { %1035 = vmatprep.subr.bf16.mxu0 %v1034_v6  ;;  %960 = vmatprep.mubr.msk.f32.mxu1 %vm70_vm0, %v61_v10  ;;  %v65_v16 = vld [vmem:[%s1407_s1 + $0x60] sm:$0xff]  ;;  %v60_v17 = vld [vmem:[%s1407_s1 + $0x38] sm:$0xff]  ;;  %v498_v20 = vld [vmem:[%s1411_s5 + $0x8] sm:$0xff] }
   0x7   :  { %1037 = vmatpush3.bf16.msra.mxu0 %v1034_v6  ;;  %961 = vmatmul.mubr.msk.f32.vlgmr.msra.gmra.mrb[0].mxu1 %vm70_vm0, %v62_v11  ;;  %v34_v18 = vld [vmem:[%s1406_s0] sm:$0xff]  ;;  %v499_v21 = vld [vmem:[%s1411_s5 + $0x10] sm:$0xff]  ;;  %v66_v22 = vld [vmem:[%s1407_s1 + $0x68] sm:$0xff] }
   0x8   :  { %976 = vmatprep.subr.mxu0 %v52_v7  ;;  %952 = vmatmul.mubr.msk.f32.gmra.mrb[2].mxu0 %vm70_vm0, %v56_v8  ;;  %v497_v19 = vld [vmem:[%s1411_s5] sm:$0xff]  ;;  %v500_v24 = vld [vmem:[%s1411_s5 + $0x18] sm:$0xff] }
   0x9   :  { %954 = vmatprep.mubr.msk.f32.mxu0 %vm70_vm0, %v57_v9  ;;  %963 = vmatprep.mubr.msk.f32.mxu1 %vm70_vm0, %v63_v13  ;;  %v1038_v23 = vpack.c.bf16 %v498_v20, %v497_v19 }
   0xb   :  { %977 = vmatpush3.msra.mxu0 %v52_v7  ;;  %964 = vmatmul.mubr.msk.f32.gmra.mrb[2].mxu1 %vm70_vm0, %v64_v15 }
   0xc   :  { %955 = vmatmul.mubr.msk.f32.gmra.mrb[4].mxu0 %vm70_vm0, %v58_v12  ;;  %966 = vmatprep.mubr.msk.f32.mxu1 %vm70_vm0, %v65_v16 }
   0xd   :  { %957 = vmatprep.mubr.msk.f32.mxu0 %vm70_vm0, %v59_v14 }
   0xe   :  { %15 = vsyncpa [#allocation4], 0  ;;  %v67_v25 = vld [vmem:[%s1407_s1 + $0x70] sm:$0xff]  ;;  %v1042_v26 = vpack.c.bf16 %v500_v24, %v499_v21  ;;  %1039 = vmatprep.subr.bf16.mxu1 %v1038_v23  ;;  %v35_v27 = vld [vmem:[%s1406_s0 + $0x8] sm:$0xff]  ;;  %vm508_vm2 = vcmask 261120  }
   0xf   :  { %967 = vmatmul.mubr.msk.f32.gmra.mrb[4].mxu1 %vm70_vm0, %v66_v22  ;;  %v36_v28 = vld [vmem:[%s1406_s0 + $0x10] sm:$0xff]  ;;  %v68_v29 = vld [vmem:[%s1407_s1 + $0x78] sm:$0xff]  ;;  %v38_v31 = vld [vmem:[%s1406_s0 + $0x20] sm:$0xff] }
  0x10   :  { %958 = vmatmul.mubr.msk.f32.gmra.mrb[6].mxu0 %vm70_vm0, %v60_v17  ;;  %969 = vmatprep.mubr.msk.f32.mxu1 %vm70_vm0, %v67_v25  ;;  %v37_v30 = vld [vmem:[%s1406_s0 + $0x18] sm:$0xff]  ;;  %v39_v32 = vld [vmem:[%s1406_s0 + $0x28] sm:$0xff]  ;;  %v40_v33 = vld [vmem:[%s1406_s0 + $0x30] sm:$0xff] }
  0x11   :  { %978 = vmatprep.mubr.msk.f32.mxu0 %vm264_vm1, %v34_v18  ;;  %1041 = vmatpush3.bf16.msra.mxu1 %v1038_v23  ;;  %v41_v34 = vld [vmem:[%s1406_s0 + $0x38] sm:$0xff]  ;;  %v42_v35 = vld [vmem:[%s1406_s0 + $0x40] sm:$0xff]  ;;  %v43_v36 = vld [vmem:[%s1406_s0 + $0x48] sm:$0xff] }
  0x12   :  { %1043 = vmatprep.subr.bf16.mxu1 %v1042_v26  ;;  %v44_v37 = vld [vmem:[%s1406_s0 + $0x50] sm:$0xff]  ;;  %v45_v38 = vld [vmem:[%s1406_s0 + $0x58] sm:$0xff]  ;;  %v46_v39 = vld [vmem:[%s1406_s0 + $0x60] sm:$0xff] }
  0x13   :  { %970 = vmatmul.mubr.msk.f32.gmra.mrb[6].mxu1 %vm70_vm0, %v68_v29  ;;  %v47_v40 = vld [vmem:[%s1406_s0 + $0x68] sm:$0xff]  ;;  %v48_v41 = vld [vmem:[%s1406_s0 + $0x70] sm:$0xff]  ;;  %v49_v42 = vld [vmem:[%s1406_s0 + $0x78] sm:$0xff] }
  0x14   :  { %979 = vmatmul.mubr.msk.f32.vlgmr.msra.gmra.mrb[0].mxu0 %vm264_vm1, %v35_v27  ;;  %v1299_v48 = vld [vmem:[%s1410_s4] ss:$0 sm:$0xff] }
  0x15   :  { %981 = vmatprep.mubr.msk.f32.mxu0 %vm264_vm1, %v36_v28  ;;  %1045 = vmatpush3.bf16.msra.mxu1 %v1042_v26 }
  0x18   :  { %982 = vmatmul.mubr.msk.f32.gmra.mrb[2].mxu0 %vm264_vm1, %v37_v30 }
  0x19   :  { %984 = vmatprep.mubr.msk.f32.mxu0 %vm264_vm1, %v38_v31 }
  0x1c   :  { %985 = vmatmul.mubr.msk.f32.gmra.mrb[4].mxu0 %vm264_vm1, %v39_v32 }
  0x1d   :  { %987 = vmatprep.mubr.msk.f32.mxu0 %vm264_vm1, %v40_v33 }
  0x20   :  { %988 = vmatmul.mubr.msk.f32.gmra.mrb[6].mxu0 %vm264_vm1, %v41_v34 }
  0x21   :  { %990 = vmatprep.mubr.msk.f32.mxu0 %vm264_vm1, %v42_v35 }
  0x24   :  { %991 = vmatmul.mubr.msk.f32.gmra.mrb[8].mxu0 %vm264_vm1, %v43_v36 }
  0x25   :  { %993 = vmatprep.mubr.msk.f32.mxu0 %vm264_vm1, %v44_v37 }
  0x28   :  { %994 = vmatmul.mubr.msk.f32.gmra.mrb[10].mxu0 %vm264_vm1, %v45_v38 }
  0x29   :  { %996 = vmatprep.mubr.msk.f32.mxu0 %vm264_vm1, %v46_v39 }
  0x2c   :  { %997 = vmatmul.mubr.msk.f32.gmra.mrb[12].mxu0 %vm264_vm1, %v47_v40 }
  0x2d   :  { %999 = vmatprep.mubr.msk.f32.mxu0 %vm264_vm1, %v48_v41 }
  0x30   :  { %1000 = vmatmul.mubr.msk.f32.gmra.mrb[14].mxu0 %vm264_vm1, %v49_v42 }
  0xda   :  { %v962_v43 = vpop.f32.mrb[0].mxu1 }
  0xdb   :  { %v225_v44 = vpop.f32.mrb[1].mxu1 }
  0xde   :  { %v965_v45 = vpop.f32.mrb[2].mxu1 }
  0xdf   :  { %v235_v46 = vpop.f32.mrb[3].mxu1 }
  0xe2   :  { %v968_v47 = vpop.f32.mrb[4].mxu1 }
  0xe3   :  { %v245_v49 = vpop.f32.mrb[5].mxu1 }
  0xe6   :  { %v971_v53 = vpop.f32.mrb[6].mxu1 }
  0xe7   :  { %v980_v50 = vpop.f32.mrb[0].mxu0  ;;  %v255_v55 = vpop.f32.mrb[7].mxu1 }
  0xe8   :  { %v466_v51 = vadd.f32 %v980_v50, %v1299_v48  ;;  %v379_v52 = vpop.f32.mrb[1].mxu0 }
  0xe9   :  { %v465_v54 = vadd.f32 %v1299_v48, %v379_v52 }
  0xea   :  { %v482_v58 = vmax.f32 %v466_v51, 0.0 }
  0xeb   :  { %v481_v56 = vmax.f32 %v465_v54, 0.0  ;;  %v983_v57 = vpop.f32.mrb[2].mxu0 }
  0xec   :  { %v468_v59 = vadd.f32 %v983_v57, %v1299_v48  ;;  %v389_v60 = vpop.f32.mrb[3].mxu0 }
  0xed   :  { %v467_v61 = vadd.f32 %v1299_v48, %v389_v60  ;;  %1010 = vmatprep.mubr.msk.f32.mxu1 %vm508_vm2, %v481_v56 }
  0xee   :  { %1011 = vmatmul.mubr.msk.f32.vlgmr.msra.gmra.mrb[8].mxu1 %vm508_vm2, %v482_v58  ;;  %v484_v0 = vmax.f32 %v468_v59, 0.0 }
  0xef   :  { %v483_v62 = vmax.f32 %v467_v61, 0.0  ;;  %v986_v63 = vpop.f32.mrb[4].mxu0 }
  0xf0   :  { %v470_v1 = vadd.f32 %v986_v63, %v1299_v48  ;;  %v399_v2 = vpop.f32.mrb[5].mxu0 }
  0xf1   :  { %v469_v3 = vadd.f32 %v1299_v48, %v399_v2  ;;  %1013 = vmatprep.mubr.msk.f32.mxu1 %vm508_vm2, %v483_v62 }
  0xf2   :  { %1014 = vmatmul.mubr.msk.f32.gmra.mrb[10].mxu1 %vm508_vm2, %v484_v0  ;;  %v486_v6 = vmax.f32 %v470_v1, 0.0 }
  0xf3   :  { %v485_v4 = vmax.f32 %v469_v3, 0.0  ;;  %v989_v5 = vpop.f32.mrb[6].mxu0 }
  0xf4   :  { %v472_v7 = vadd.f32 %v989_v5, %v1299_v48  ;;  %v409_v8 = vpop.f32.mrb[7].mxu0 }
  0xf5   :  { %v471_v9 = vadd.f32 %v1299_v48, %v409_v8  ;;  %1016 = vmatprep.mubr.msk.f32.mxu1 %vm508_vm2, %v485_v4 }
  0xf6   :  { %1017 = vmatmul.mubr.msk.f32.gmra.mrb[12].mxu1 %vm508_vm2, %v486_v6  ;;  %v488_v12 = vmax.f32 %v472_v7, 0.0 }
  0xf7   :  { %v487_v10 = vmax.f32 %v471_v9, 0.0  ;;  %v992_v11 = vpop.f32.mrb[8].mxu0 }
  0xf8   :  { %v425_v13 = vadd.f32 %v992_v11, %v962_v43  ;;  %v419_v14 = vpop.f32.mrb[9].mxu0 }
  0xf9   :  { %v420_v15 = vadd.f32 %v419_v14, %v225_v44  ;;  %1019 = vmatprep.mubr.msk.f32.mxu1 %vm508_vm2, %v487_v10  ;;  %v1336_v44 = vld [vmem:[%s1412_s6] ss:$0 sm:$0xff] }
  0xfa   :  { %v474_v16 = vadd.f32 %v1299_v48, %v425_v13  ;;  %1020 = vmatmul.mubr.msk.f32.gmra.mrb[14].mxu1 %vm508_vm2, %v488_v12 }
  0xfb   :  { %v473_v17 = vadd.f32 %v1299_v48, %v420_v15  ;;  %v995_v18 = vpop.f32.mrb[10].mxu0 }
  0xfc   :  { %v490_v19 = vmax.f32 %v474_v16, 0.0  ;;  %v435_v20 = vadd.f32 %v995_v18, %v965_v45  ;;  %v429_v21 = vpop.f32.mrb[11].mxu0 }
  0xfd   :  { %v489_v22 = vmax.f32 %v473_v17, 0.0  ;;  %v430_v23 = vadd.f32 %v429_v21, %v235_v46 }
  0xfe   :  { %v476_v24 = vadd.f32 %v1299_v48, %v435_v20 }
  0xff   :  { %v475_v25 = vadd.f32 %v1299_v48, %v430_v23  ;;  %v998_v26 = vpop.f32.mrb[12].mxu0  ;;  %1022 = vmatprep.mubr.msk.f32.mxu1 %vm508_vm2, %v489_v22 }
 0x100   :  { %v492_v27 = vmax.f32 %v476_v24, 0.0  ;;  %v445_v28 = vadd.f32 %v998_v26, %v968_v47  ;;  %v439_v29 = vpop.f32.mrb[13].mxu0  ;;  %1023 = vmatmul.mubr.msk.f32.gmra.mrb[16].mxu1 %vm508_vm2, %v490_v19 }
 0x101   :  { %v491_v30 = vmax.f32 %v475_v25, 0.0  ;;  %v440_v31 = vadd.f32 %v439_v29, %v245_v49  ;;  %v1343_v49 = vld [vmem:[%s1413_s7] ss:$0 sm:$0xff] }
 0x102   :  { %v478_v32 = vadd.f32 %v1299_v48, %v445_v28 }
 0x103   :  { %v477_v33 = vadd.f32 %v1299_v48, %v440_v31  ;;  %v1001_v34 = vpop.f32.mrb[14].mxu0  ;;  %1025 = vmatprep.mubr.msk.f32.mxu1 %vm508_vm2, %v491_v30 }
 0x104   :  { %v494_v35 = vmax.f32 %v478_v32, 0.0  ;;  %v455_v36 = vadd.f32 %v1001_v34, %v971_v53  ;;  %v449_v37 = vpop.f32.mrb[15].mxu0  ;;  %1026 = vmatmul.mubr.msk.f32.gmra.mrb[18].mxu1 %vm508_vm2, %v492_v27 }
 0x105   :  { %v493_v38 = vmax.f32 %v477_v33, 0.0  ;;  %v450_v39 = vadd.f32 %v449_v37, %v255_v55 }
 0x106   :  { %v480_v40 = vadd.f32 %v1299_v48, %v455_v36 }
 0x107   :  { %v479_v41 = vadd.f32 %v1299_v48, %v450_v39  ;;  %1028 = vmatprep.mubr.msk.f32.mxu1 %vm508_vm2, %v493_v38 }
 0x108   :  { %v496_v42 = vmax.f32 %v480_v40, 0.0  ;;  %1029 = vmatmul.mubr.msk.f32.gmra.mrb[20].mxu1 %vm508_vm2, %v494_v35 }
 0x109   :  { %v495_v43 = vmax.f32 %v479_v41, 0.0 }
 0x10b   :  { %1031 = vmatprep.mubr.msk.f32.mxu1 %vm508_vm2, %v495_v43 }
 0x10c   :  { %1032 = vmatmul.mubr.msk.f32.gmra.mrb[22].mxu1 %vm508_vm2, %v496_v42 }
 0x1c1   :  { %v1012_v45 = vpop.f32.mrb[8].mxu1 }
 0x1c2   :  { %v629_v46 = vadd.f32 %v1012_v45, %v1336_v44  ;;  %v623_v47 = vpop.f32.mrb[9].mxu1 }
 0x1c3   :  { %v624_v48 = vadd.f32 %v1336_v44, %v623_v47 }
 0x1c4   :  { %v703_v50 = vmax.f32 %v629_v46, 0.0 }
 0x1c5   :  { %v702_v51 = vmax.f32 %v624_v48, 0.0  ;;  %v1015_v52 = vpop.f32.mrb[10].mxu1 }
 0x1c6   :  { %v639_v53 = vadd.f32 %v1015_v52, %v1336_v44  ;;  %v633_v54 = vpop.f32.mrb[11].mxu1  ;;  %v726_v55 = vmul.f32 %v1343_v49, %v703_v50 }
 0x1c7   :  { %v634_v56 = vadd.f32 %v1336_v44, %v633_v54  ;;  %v725_v59 = vmul.f32 %v1343_v49, %v702_v51 }
 0x1c8   :  { %v705_v57 = vmax.f32 %v639_v53, 0.0  ;;  %v744_v58 = vsel %vm508_vm2, %v726_v55, 0.0 }
 0x1c9   :  { %v704_v60 = vmax.f32 %v634_v56, 0.0  ;;  %745 = vadd.xlane.f32.xlu0 %v744_v58  ;;  %v1018_v61 = vpop.f32.mrb[12].mxu1  ;;  %v741_v3 = vsel %vm508_vm2, %v725_v59, 0.0 }
 0x1ca   :  { %v649_v62 = vadd.f32 %v1018_v61, %v1336_v44  ;;  %v643_v63 = vpop.f32.mrb[13].mxu1  ;;  %v728_v0 = vmul.f32 %v1343_v49, %v705_v57 }
 0x1cb   :  { %v644_v1 = vadd.f32 %v1336_v44, %v643_v63  ;;  %v727_v5 = vmul.f32 %v1343_v49, %v704_v60  ;;  %v790_v63 = vstv %s1414_s8  ;;  %s1091_s8 = smov [#allocation3]  }
 0x1cc   :  { %v707_v2 = vmax.f32 %v649_v62, 0.0  ;;  %v750_v4 = vsel %vm508_vm2, %v728_v0, 0.0  ;;  %s828_s19 = sshll.u32 %s1091_s8, 4  ;;  %s829_s19 = int_to_ptr.vmem [resolvable:$true] %s828_s19 }
 0x1cd   :  { %v706_v6 = vmax.f32 %v644_v1, 0.0  ;;  %742 = vadd.xlane.f32.xlu0 %v741_v3  ;;  %751 = vadd.xlane.f32.xlu1 %v750_v4  ;;  %v1021_v7 = vpop.f32.mrb[14].mxu1  ;;  %v747_v13 = vsel %vm508_vm2, %v727_v5, 0.0  ;;  %s1067_s20 = scalar_lea.vmem %s829_s19, 2048  ;;  %p1072_p1 = scmp.lt.s32.totalorder %s829_s19, %s829_s19 }
 0x1ce   :  { %v659_v8 = vadd.f32 %v1021_v7, %v1336_v44  ;;  %v653_v9 = vpop.f32.mrb[15].mxu1  ;;  %v730_v14 = vmul.f32 %v1343_v49, %v707_v2  ;;  %p1068_p0 = scmp.ne.s32.totalorder %s829_s19, %s1067_s20  ;;  %p1073_p2 = scmp.lt.s32.totalorder %s1067_s20, %s1067_s20 }
 0x1cf   :  { %v654_v10 = vadd.f32 %v1336_v44, %v653_v9  ;;  %v729_v11 = vmul.f32 %v1343_v49, %v706_v6 }
 0x1d0   :  { %v709_v12 = vmax.f32 %v659_v8, 0.0  ;;  %v756_v21 = vsel %vm508_vm2, %v730_v14, 0.0  ;;  %p1074_p3 = por %p1073_p2, %p1072_p1 }
 0x1d1   :  { %v708_v15 = vmax.f32 %v654_v10, 0.0  ;;  %748 = vadd.xlane.f32.xlu1 %v747_v13  ;;  %v753_v16 = vsel %vm508_vm2, %v729_v11, 0.0 }
 0x1d2   :  { %754 = vadd.xlane.f32.xlu0 %v753_v16  ;;  %v732_v22 = vmul.f32 %v1343_v49, %v709_v12  ;;  %p1075_p4 = pnand %p1074_p3, %p1068_p0 }
 0x1d3   :  { %v1024_v17 = vpop.f32.mrb[16].mxu1  ;;  %v731_v18 = vmul.f32 %v1343_v49, %v708_v15 }
 0x1d4   :  { %v669_v19 = vadd.f32 %v1024_v17, %v1336_v44  ;;  %v663_v20 = vpop.f32.mrb[17].mxu1  ;;  %v762_v30 = vsel %vm508_vm2, %v732_v22, 0.0 }
 0x1d5   :  { %v664_v23 = vadd.f32 %v1336_v44, %v663_v20  ;;  %757 = vadd.xlane.f32.xlu1 %v756_v21  ;;  %v759_v24 = vsel %vm508_vm2, %v731_v18, 0.0 }
 0x1d6   :  { %v711_v25 = vmax.f32 %v669_v19, 0.0  ;;  %760 = vadd.xlane.f32.xlu0 %v759_v24 }
 0x1d7   :  { %v710_v26 = vmax.f32 %v664_v23, 0.0  ;;  %v1027_v27 = vpop.f32.mrb[18].mxu1 }
 0x1d8   :  { %v679_v28 = vadd.f32 %v1027_v27, %v1336_v44  ;;  %v673_v29 = vpop.f32.mrb[19].mxu1  ;;  %v734_v31 = vmul.f32 %v1343_v49, %v711_v25 }
 0x1d9   :  { %v674_v32 = vadd.f32 %v1336_v44, %v673_v29  ;;  %763 = vadd.xlane.f32.xlu1 %v762_v30  ;;  %v733_v33 = vmul.f32 %v1343_v49, %v710_v26 }
 0x1da   :  { %v713_v34 = vmax.f32 %v679_v28, 0.0  ;;  %v768_v40 = vsel %vm508_vm2, %v734_v31, 0.0 }
 0x1db   :  { %v712_v35 = vmax.f32 %v674_v32, 0.0  ;;  %v1030_v36 = vpop.f32.mrb[20].mxu1  ;;  %v765_v37 = vsel %vm508_vm2, %v733_v33, 0.0 }
 0x1dc   :  { %v689_v38 = vadd.f32 %v1030_v36, %v1336_v44  ;;  %v683_v39 = vpop.f32.mrb[21].mxu1  ;;  %766 = vadd.xlane.f32.xlu0 %v765_v37  ;;  %v736_v41 = vmul.f32 %v1343_v49, %v713_v34 }
 0x1dd   :  { %v684_v42 = vadd.f32 %v1336_v44, %v683_v39  ;;  %769 = vadd.xlane.f32.xlu1 %v768_v40  ;;  %v735_v43 = vmul.f32 %v1343_v49, %v712_v35 }
 0x1de   :  { %v715_v45 = vmax.f32 %v689_v38, 0.0  ;;  %v774_v52 = vsel %vm508_vm2, %v736_v41, 0.0 }
 0x1df   :  { %v714_v46 = vmax.f32 %v684_v42, 0.0  ;;  %v1033_v47 = vpop.f32.mrb[22].mxu1  ;;  %v771_v48 = vsel %vm508_vm2, %v735_v43, 0.0 }
 0x1e0   :  { %v699_v50 = vadd.f32 %v1033_v47, %v1336_v44  ;;  %v693_v51 = vpop.f32.mrb[23].mxu1  ;;  %772 = vadd.xlane.f32.xlu0 %v771_v48  ;;  %v738_v53 = vmul.f32 %v1343_v49, %v715_v45 }
 0x1e1   :  { %v694_v54 = vadd.f32 %v1336_v44, %v693_v51  ;;  %775 = vadd.xlane.f32.xlu1 %v774_v52  ;;  %v737_v55 = vmul.f32 %v1343_v49, %v714_v46 }
 0x1e2   :  { %v717_v56 = vmax.f32 %v699_v50, 0.0  ;;  %v780_v59 = vsel %vm508_vm2, %v738_v53, 0.0 }
 0x1e3   :  { %v716_v57 = vmax.f32 %v694_v54, 0.0  ;;  %v777_v58 = vsel %vm508_vm2, %v737_v55, 0.0 }
 0x1e4   :  { %778 = vadd.xlane.f32.xlu0 %v777_v58  ;;  %v740_v60 = vmul.f32 %v1343_v49, %v717_v56 }
 0x1e5   :  { %781 = vadd.xlane.f32.xlu1 %v780_v59  ;;  %v739_v61 = vmul.f32 %v1343_v49, %v716_v57 }
 0x1e6   :  { %v786_v44 = vsel %vm508_vm2, %v740_v60, 0.0 }
 0x1e7   :  { %v783_v62 = vsel %vm508_vm2, %v739_v61, 0.0 }
 0x1e8   :  { %784 = vadd.xlane.f32.xlu0 %v783_v62 }
 0x1e9   :  { %787 = vadd.xlane.f32.xlu1 %v786_v44 }
 0x256   :  { %v746_v0 = vpop.xlane.xlu0 %745 }
 0x257   :  { %v792_v1 = vadd.f32 %v790_v63, %v746_v0 }
 0x259   :  { %808 = vst [vmem:[#allocation3 + $0x8] sm:$0xff] %v792_v1 }
 0x25a   :  { %v743_v2 = vpop.xlane.xlu0 %742  ;;  %v752_v3 = vpop.xlane.xlu1 %751 }
 0x25b   :  { %v791_v4 = vadd.f32 %v790_v63, %v743_v2  ;;  %v794_v5 = vadd.f32 %v790_v63, %v752_v3 }
 0x25d   :  { %807 = vst [vmem:[#allocation3] sm:$0xff] %v791_v4  ;;  %810 = vst [vmem:[#allocation3 + $0x18] sm:$0xff] %v794_v5 }
 0x25e   :  { %v749_v49 = vpop.xlane.xlu1 %748 }
 0x25f   :  { %v793_v6 = vadd.f32 %v790_v63, %v749_v49  ;;  %v755_v7 = vpop.xlane.xlu0 %754 }
 0x260   :  { %v795_v8 = vadd.f32 %v790_v63, %v755_v7 }
 0x261   :  { %809 = vst [vmem:[#allocation3 + $0x10] sm:$0xff] %v793_v6 }
 0x262   :  { %811 = vst [vmem:[#allocation3 + $0x20] sm:$0xff] %v795_v8  ;;  %v758_v9 = vpop.xlane.xlu1 %757 }
 0x263   :  { %v796_v10 = vadd.f32 %v790_v63, %v758_v9  ;;  %v761_v11 = vpop.xlane.xlu0 %760 }
 0x264   :  { %v797_v12 = vadd.f32 %v790_v63, %v761_v11 }
 0x265   :  { %812 = vst [vmem:[#allocation3 + $0x28] sm:$0xff] %v796_v10 }
 0x266   :  { %813 = vst [vmem:[#allocation3 + $0x30] sm:$0xff] %v797_v12  ;;  %v764_v13 = vpop.xlane.xlu1 %763 }
 0x267   :  { %v798_v14 = vadd.f32 %v790_v63, %v764_v13 }
 0x269   :  { %814 = vst [vmem:[#allocation3 + $0x38] sm:$0xff] %v798_v14  ;;  %v767_v15 = vpop.xlane.xlu0 %766 }
 0x26a   :  { %v799_v16 = vadd.f32 %v790_v63, %v767_v15  ;;  %v770_v17 = vpop.xlane.xlu1 %769 }
 0x26b   :  { %v800_v18 = vadd.f32 %v790_v63, %v770_v17 }
 0x26c   :  { %815 = vst [vmem:[#allocation3 + $0x40] sm:$0xff] %v799_v16 }
 0x26d   :  { %816 = vst [vmem:[#allocation3 + $0x48] sm:$0xff] %v800_v18  ;;  %v773_v19 = vpop.xlane.xlu0 %772 }
 0x26e   :  { %v801_v20 = vadd.f32 %v790_v63, %v773_v19  ;;  %v776_v21 = vpop.xlane.xlu1 %775 }
 0x26f   :  { %v802_v22 = vadd.f32 %v790_v63, %v776_v21 }
 0x270   :  { %817 = vst [vmem:[#allocation3 + $0x50] sm:$0xff] %v801_v20 }
 0x271   :  { %818 = vst [vmem:[#allocation3 + $0x58] sm:$0xff] %v802_v22  ;;  %v779_v23 = vpop.xlane.xlu0 %778 }
 0x272   :  { %v803_v24 = vadd.f32 %v790_v63, %v779_v23  ;;  %v782_v25 = vpop.xlane.xlu1 %781 }
 0x273   :  { %v804_v26 = vadd.f32 %v790_v63, %v782_v25 }
 0x274   :  { %819 = vst [vmem:[#allocation3 + $0x60] sm:$0xff] %v803_v24 }
 0x275   :  { %820 = vst [vmem:[#allocation3 + $0x68] sm:$0xff] %v804_v26  ;;  %v785_v27 = vpop.xlane.xlu0 %784 }
 0x276   :  { %v805_v28 = vadd.f32 %v790_v63, %v785_v27  ;;  %v788_v29 = vpop.xlane.xlu1 %787 }
 0x277   :  { %v806_v30 = vadd.f32 %v790_v63, %v788_v29 }
 0x278   :  { %821 = vst [vmem:[#allocation3 + $0x70] sm:$0xff] %v805_v28 }
 0x279   :  { %822 = vst [vmem:[#allocation3 + $0x78] sm:$0xff] %v806_v30 }
 0x27a   :  { %1078 = shalt.err (!%p1075_p4)
}
 0x27b   :  { %s1079_s23 = scalar_lea.hbm %s1415_s9, 2048 }
 0x27c   :  { %p1080_p5 = scmp.ne.s32.totalorder %s1415_s9, %s1079_s23  ;;  %p1083_p6 = scmp.lt.u32.totalorder %s1079_s23, %s1415_s9 }
 0x27e   :  { %p1085_p7 = pnand %p1083_p6, %p1080_p5 }
 0x280   :  { %1088 = shalt.err (!%p1085_p7)
}
 0x281   :  { %s1092_s2 = smov 128   ;;  %s1093_s28 = smov 8  }
 0x282   :  { %834 = dma.vmem_to_hbm [thread:$0]  %s829_s19, 2048, %s1415_s9, [#allocation4], %s1092_s2, %s1092_s2, %s1093_s28  }
 0x283   :  { %1089 = dma.done.wait [#allocation4], 2048  }
 0x284   :  { %1090 = vsyncadd [#allocation4], 4294965248 }
 0x285   :  { %838 = vsyncpa [#allocation4], 1 }

</bundles_post_ra>
